<compile_context>
chip_gen: v7x
topology: tpu7x:2x2x1
jax: 0.10.0
libtpu: 0.0.40
codegen_flags: <defaults>
</compile_context>

<pallas_src>
import numpy as np
import jax
import jax.numpy as jnp
from jax.experimental import pallas as pl
from jax.experimental.pallas import tpu as pltpu

_BF16 = jnp.bfloat16


def _mish(x):
    # mish(x) = x * tanh(softplus(x)) = x * ((1+e^x)^2 - 1) / ((1+e^x)^2 + 1)
    # One exp + one EUP reciprocal.  Clamp keeps (1+e^x)^2 finite; for x >= 20
    # the ratio is exactly 1.0 in f32, matching the true limit (mish(x) -> x).
    e = jnp.exp(jnp.minimum(x, 20.0))
    n = (1.0 + e) * (1.0 + e)
    return x * (n - 1.0) * pl.reciprocal(n + 1.0, approx=True)


# --------------------- kernel 1: object SumReadout (feature-major) ------------
# Gridded over object tiles (reduction axis).  Per tile:
#   acc += obj_emb^T @ onehot(seg_ids)             # segment-sum on the MXU
# On the last tile:
#   objcT = w3o^T @ ( w2^T @ mish( w1^T @ acc + b1 ) + b2 )   -> [2E, G] bf16
def _object_readout_kernel(objT_ref, seg_ref, w1T_ref, b1_ref,
                           w2T_ref, b2_ref, w3oT_ref, out_ref, acc_ref):
    k = pl.program_id(0)

    @pl.when(k == 0)
    def _():
        acc_ref[...] = jnp.zeros_like(acc_ref)

    to = seg_ref.shape[0]
    g = out_ref.shape[1]
    # Exact one-hot built on the VPU from the int32 segment-id column.
    # Padded rows carry seg id == G -> all-zero one-hot -> contribute nothing.
    oh = (seg_ref[...] ==
          jax.lax.broadcasted_iota(jnp.int32, (to, g), 1)).astype(_BF16)
    acc_ref[...] += jnp.dot(objT_ref[...], oh,
                            preferred_element_type=jnp.float32)          # [E, G]

    @pl.when(k == pl.num_programs(0) - 1)
    def _():
        seg_sumT = acc_ref[...].astype(_BF16)
        h = _mish(jnp.dot(w1T_ref[...], seg_sumT,
                          preferred_element_type=jnp.float32) + b1_ref[...])
        aggT = (jnp.dot(w2T_ref[...], h.astype(_BF16),
                        preferred_element_type=jnp.float32) + b2_ref[...])
        out_ref[...] = jnp.dot(w3oT_ref[...], aggT.astype(_BF16),
                               preferred_element_type=jnp.float32
                               ).astype(out_ref.dtype)                    # [2E, G]


# --------- kernel 2: per-action value head, gridded over action tiles ---------
# Per tile of TA actions (feature-major, lane = action axis):
#   oh  = onehot(action seg ids)                             # [G, TA] in-kernel
#   h   = mish( w3a^T @ act^T + objc^T @ oh + b3 )           # [2E, TA]
#   val = sum(h * w4, axis=0) + b4                           # [1, TA]  lane-dense
def _action_value_kernel(actT_ref, seg_ref, w3aT_ref, objcT_ref,
                         b3_ref, w4_ref, b4_ref, out_ref):
    g = objcT_ref.shape[1]
    ta = actT_ref.shape[1]
    oh = (seg_ref[...] ==
          jax.lax.broadcasted_iota(jnp.int32, (g, ta), 0)).astype(_BF16)
    pre = (jnp.dot(w3aT_ref[...], actT_ref[...],
                   preferred_element_type=jnp.float32)
           + jnp.dot(objcT_ref[...], oh,
                     preferred_element_type=jnp.float32)
           + b3_ref[...])                                     # [2E, TA] f32
    h = _mish(pre)
    # Linear(2E -> 1) as VPU multiply + sublane reduce (keeps the MXU free and
    # produces a lane-dense row directly).
    out_ref[...] = (jnp.sum(h * w4_ref[...], axis=0, keepdims=True)
                    + b4_ref[...])                            # [1, TA]


def _round_up(x, m):
    return ((x + m - 1) // m) * m


def action_scalar_readout(node_embeddings, action_indices, object_indices,
                          object_sizes, action_sizes, params):
    """Pallas-backed forward pass. Returns a list of 1-D per-graph value arrays."""
    object_sizes = np.asarray(object_sizes, dtype=np.int64)
    action_sizes = np.asarray(action_sizes, dtype=np.int64)
    G = int(object_sizes.shape[0])
    O = int(object_sizes.sum())
    A = int(action_sizes.sum())
    E = int(node_embeddings.shape[1])
    E2 = 2 * E

    w1, b1, w2, b2, w3, b3, w4, b4 = params
    w3a, w3o = w3[:E], w3[E:]          # split of the folded concat matmul

    # ---- glue: bf16-first so the XLA gather / transpose / pad move half the bytes
    ne_bf16 = jnp.asarray(node_embeddings).astype(_BF16)
    # TODO(synk): the node-embedding row gathers (index_select) stay in XLA; an
    # in-kernel per-row DMA gather of 64-byte rows (E=32) is not worthwhile.

    # ---- object-axis tiling (kernel 1 is gridded over O, so big object sets
    #      never have to be VMEM-resident: v7x 64 MiB phys / v5e 16 MiB scoped)
    TO = 512 if O > 512 else _round_up(max(O, 1), 128)
    num_o_tiles = pl.cdiv(O, TO)
    O_pad = num_o_tiles * TO
    objT = jnp.pad(ne_bf16[object_indices], ((0, O_pad - O), (0, 0))).T   # [E, O_pad]

    # ---- action-axis tiling: fat lane-dense tiles (<=1024); when there is enough
    #      work, keep >=2 tiles so v7x's two TensorCores both run (cheap elsewhere).
    if A <= 128:
        TA = 128
    else:
        TA = min(1024, _round_up(pl.cdiv(A, 2), 128))
    num_a_tiles = pl.cdiv(A, TA)
    A_pad = num_a_tiles * TA
    actT = jnp.pad(ne_bf16[action_indices], ((0, A_pad - A), (0, 0))).T   # [E, A_pad]

    # ---- segment ids (tiny int32 vectors; dense one-hots are built in-kernel)
    obj_seg = np.full((O_pad,), G, np.int32)       # pad value G matches no graph
    obj_seg[:O] = np.repeat(np.arange(G, dtype=np.int32), object_sizes)
    act_seg = np.full((A_pad,), G, np.int32)
    act_seg[:A] = np.repeat(np.arange(G, dtype=np.int32), action_sizes)
    obj_seg_col = jnp.asarray(obj_seg).reshape(O_pad, 1)
    act_seg_row = jnp.asarray(act_seg).reshape(1, A_pad)

    def full(shape):
        return pl.BlockSpec(shape, lambda i: (0, 0))

    # ---- kernel 1: object SumReadout + MLP folded with w3o  ->  objcT [2E, G] bf16
    objcT = pl.pallas_call(
        _object_readout_kernel,
        out_shape=jax.ShapeDtypeStruct((E2, G), _BF16),
        grid=(num_o_tiles,),
        in_specs=[
            pl.BlockSpec((E, TO), lambda k: (0, k)),       # object embedding tile
            pl.BlockSpec((TO, 1), lambda k: (k, 0)),       # object segment ids
            full((E, E)), full((E, 1)),                    # w1^T, b1
            full((E, E)), full((E, 1)),                    # w2^T, b2
            full((E2, E)),                                 # w3o^T
        ],
        out_specs=pl.BlockSpec((E2, G), lambda k: (0, 0)), # resident across O tiles
        scratch_shapes=[pltpu.VMEM((E, G), jnp.float32)],  # seg-sum accumulator
        compiler_params=pltpu.CompilerParams(
            dimension_semantics=("arbitrary",),
            vmem_limit_bytes=32 * 1024 * 1024),
    )(objT, obj_seg_col,
      w1.T.astype(_BF16), b1[:, None].astype(jnp.float32),
      w2.T.astype(_BF16), b2[:, None].astype(jnp.float32),
      w3o.T.astype(_BF16))

    # ---- kernel 2: action-value head, pipelined + parallel over action tiles
    vals = pl.pallas_call(
        _action_value_kernel,
        out_shape=jax.ShapeDtypeStruct((1, A_pad), jnp.float32),
        grid=(num_a_tiles,),
        in_specs=[
            pl.BlockSpec((E, TA), lambda i: (0, i)),       # action embeddings tile
            pl.BlockSpec((1, TA), lambda i: (0, i)),       # action segment-id row
            full((E2, E)),                                 # w3a^T (resident)
            full((E2, G)),                                 # objc^T (resident, bf16)
            full((E2, 1)),                                 # b3 column
            full((E2, 1)),                                 # w4 column
            full((1, 1)),                                  # b4
        ],
        out_specs=pl.BlockSpec((1, TA), lambda i: (0, i)), # lane-dense output row
        compiler_params=pltpu.CompilerParams(
            dimension_semantics=("parallel",),
            vmem_limit_bytes=32 * 1024 * 1024),
    )(actT, act_seg_row,
      w3a.T.astype(_BF16), objcT,
      b3[:, None].astype(jnp.float32), w4.astype(jnp.float32),
      b4.reshape(1, 1).astype(jnp.float32))

    # ---- glue: drop padding, ragged split into per-graph flattened vectors
    flat = vals[0, :A]
    splits = np.cumsum(action_sizes)[:-1].tolist()
    return [v.reshape(-1) for v in jnp.split(flat, splits)]


def _reference(node_embeddings, action_indices, object_indices,
               object_sizes, action_sizes, params):
    """Pure numpy (f32) reference matching the PyTorch module semantics."""
    w1, b1, w2, b2, w3, b3, w4, b4 = [np.asarray(p, np.float32) for p in params]
    ne = np.asarray(node_embeddings, np.float32)
    act_emb = ne[np.asarray(action_indices)]
    obj_emb = ne[np.asarray(object_indices)]
    object_sizes = np.asarray(object_sizes)
    action_sizes = np.asarray(action_sizes)
    G = len(object_sizes)
    seg = np.repeat(np.arange(G), object_sizes)
    seg_sum = np.zeros((G, ne.shape[1]), np.float32)
    np.add.at(seg_sum, seg, obj_emb)

    def mish(x):
        return x * np.tanh(np.logaddexp(0.0, x))   # stable softplus

    obj_agg = mish(seg_sum @ w1 + b1) @ w2 + b2
    rep = np.repeat(obj_agg, action_sizes, axis=0)
    x = np.concatenate([act_emb, rep], axis=1)
    vals = mish(x @ w3 + b3) @ w4 + b4
    out, idx = [], 0
    for s in action_sizes:
        out.append(vals[idx:idx + s].reshape(-1))
        idx += s
    return out


if __name__ == "__main__":
    E = 32            # embedding_size
    N = 24            # total number of nodes in the batched graph
    object_sizes = np.array([3, 4, 5], dtype=np.int64)   # objects per graph
    action_sizes = np.array([2, 3, 4], dtype=np.int64)   # actions per graph
    O = int(object_sizes.sum())
    A = int(action_sizes.sum())

    key = jax.random.PRNGKey(0)
    keys = jax.random.split(key, 12)

    node_embeddings = jax.random.normal(keys[0], (N, E), dtype=jnp.float32)
    action_indices = jax.random.randint(keys[1], (A,), 0, N, dtype=jnp.int32)
    object_indices = jax.random.randint(keys[2], (O,), 0, N, dtype=jnp.int32)

    # Deterministic synthetic parameters (Linear weights stored as [in, out]).
    s = 0.1
    w1 = s * jax.random.normal(keys[3], (E, E), dtype=jnp.float32)
    b1 = s * jax.random.normal(keys[4], (E,), dtype=jnp.float32)
    w2 = s * jax.random.normal(keys[5], (E, E), dtype=jnp.float32)
    b2 = s * jax.random.normal(keys[6], (E,), dtype=jnp.float32)
    w3 = s * jax.random.normal(keys[7], (2 * E, 2 * E), dtype=jnp.float32)
    b3 = s * jax.random.normal(keys[8], (2 * E,), dtype=jnp.float32)
    w4 = s * jax.random.normal(keys[9], (2 * E, 1), dtype=jnp.float32)
    b4 = s * jax.random.normal(keys[10], (1,), dtype=jnp.float32)
    params = (w1, b1, w2, b2, w3, b3, w4, b4)

    out_list = action_scalar_readout(node_embeddings, action_indices,
                                     object_indices, object_sizes,
                                     action_sizes, params)
    out_list = [jax.block_until_ready(o) for o in out_list]

    ref_list = _reference(node_embeddings, action_indices, object_indices,
                          object_sizes, action_sizes, params)
    # Tolerance reflects bf16 matmul operands (f32 accumulation) vs. f32 ref.
    for got, ref in zip(out_list, ref_list):
        np.testing.assert_allclose(np.asarray(got, np.float32), ref,
                                   rtol=5e-2, atol=3e-2)

    print("KERNEL_OK")
</pallas_src>

<mosaic_0001>
module attributes {stable_mosaic.version = 11 : i64} {
  func.func @_object_readout_kernel(%arg0: i32, %arg1: memref<32x128xbf16, #tpu.memory_space<vmem>>, %arg2: memref<128x1xi32, #tpu.memory_space<vmem>>, %arg3: memref<32x32xbf16, #tpu.memory_space<vmem>>, %arg4: memref<32x1xf32, #tpu.memory_space<vmem>>, %arg5: memref<32x32xbf16, #tpu.memory_space<vmem>>, %arg6: memref<32x1xf32, #tpu.memory_space<vmem>>, %arg7: memref<64x32xbf16, #tpu.memory_space<vmem>>, %arg8: memref<64x3xbf16, #tpu.memory_space<vmem>>, %arg9: memref<32x3xf32, #tpu.memory_space<vmem>>) attributes {dimension_semantics = [#tpu.dimension_semantics<arbitrary>], iteration_bounds = array<i64: 1>, scalar_prefetch = 0 : i64, scratch_operands = 1 : i64, tpu.core_type = #tpu.core_type<tc>, window_params = [{transform_indices = @transform_0, window_bounds = array<i64: 32, 128>}, {transform_indices = @transform_1, window_bounds = array<i64: 128, 1>}, {pipeline_mode = #tpu.pipeline_mode<synchronous>, transform_indices = @transform_2, window_bounds = array<i64: 32, 32>}, {pipeline_mode = #tpu.pipeline_mode<synchronous>, transform_indices = @transform_3, window_bounds = array<i64: 32, 1>}, {pipeline_mode = #tpu.pipeline_mode<synchronous>, transform_indices = @transform_4, window_bounds = array<i64: 32, 32>}, {pipeline_mode = #tpu.pipeline_mode<synchronous>, transform_indices = @transform_5, window_bounds = array<i64: 32, 1>}, {pipeline_mode = #tpu.pipeline_mode<synchronous>, transform_indices = @transform_6, window_bounds = array<i64: 64, 32>}, {pipeline_mode = #tpu.pipeline_mode<synchronous>, transform_indices = @transform_7, window_bounds = array<i64: 64, 3>}]} {
    %c0_i32 = arith.constant 0 : i32
    %0 = arith.cmpi eq, %arg0, %c0_i32 : i32
    %1 = arith.extui %0 : i1 to i32
    %c0_i32_0 = arith.constant 0 : i32
    %2 = arith.cmpi ne, %1, %c0_i32_0 : i32
    scf.if %2 {
      %cst_10 = arith.constant 0.000000e+00 : f32
      %18 = vector.broadcast %cst_10 : f32 to vector<32x3xf32>
      %c0_11 = arith.constant 0 : index
      %c0_12 = arith.constant 0 : index
      %19 = vector.load %arg9[%c0_11, %c0_12] : memref<32x3xf32, #tpu.memory_space<vmem>>, vector<32x3xf32>
      tpu.vector_store %arg9[%c0_11, %c0_12], %18 {strides = array<i32>} : memref<32x3xf32, #tpu.memory_space<vmem>>, vector<32x3xf32>,
    } else {
    }
    %c0 = arith.constant 0 : index
    %c0_1 = arith.constant 0 : index
    %3 = vector.load %arg2[%c0, %c0_1] : memref<128x1xi32, #tpu.memory_space<vmem>>, vector<128x1xi32>
    %4 = tpu.iota {dimensions = array<i32: 1>} : vector<128x3xi32>
    %5 = vector.broadcast %3 : vector<128x1xi32> to vector<128x3xi32>
    %6 = arith.cmpi eq, %5, %4 : vector<128x3xi32>
    %7 = arith.extui %6 : vector<128x3xi1> to vector<128x3xi32>
    %8 = arith.sitofp %7 : vector<128x3xi32> to vector<128x3xf32>
    %9 = arith.truncf %8 : vector<128x3xf32> to vector<128x3xbf16>
    %c0_2 = arith.constant 0 : index
    %c0_3 = arith.constant 0 : index
    %10 = vector.load %arg9[%c0_2, %c0_3] : memref<32x3xf32, #tpu.memory_space<vmem>>, vector<32x3xf32>
    %c0_4 = arith.constant 0 : index
    %c0_5 = arith.constant 0 : index
    %11 = vector.load %arg1[%c0_4, %c0_5] : memref<32x128xbf16, #tpu.memory_space<vmem>>, vector<32x128xbf16>
    %cst = arith.constant dense<0.000000e+00> : vector<32x3xf32>
    %12 = tpu.matmul %11, %9, %cst {dimension_numbers = #tpu.dot_dimension_numbers<[1], [0], [0], [1], [0, 0, 1, 1], [], []>} : vector<32x128xbf16>, vector<128x3xbf16>, vector<32x3xf32> -> vector<32x3xf32>
    %13 = arith.addf %10, %12 : vector<32x3xf32>
    %c0_6 = arith.constant 0 : index
    %c0_7 = arith.constant 0 : index
    %14 = vector.load %arg9[%c0_6, %c0_7] : memref<32x3xf32, #tpu.memory_space<vmem>>, vector<32x3xf32>
    tpu.vector_store %arg9[%c0_6, %c0_7], %13 {strides = array<i32>} : memref<32x3xf32, #tpu.memory_space<vmem>>, vector<32x3xf32>,
    %c0_i32_8 = arith.constant 0 : i32
    %15 = arith.cmpi eq, %arg0, %c0_i32_8 : i32
    %16 = arith.extui %15 : i1 to i32
    %c0_i32_9 = arith.constant 0 : i32
    %17 = arith.cmpi ne, %16, %c0_i32_9 : i32
    scf.if %17 {
      %c0_10 = arith.constant 0 : index
      %c0_11 = arith.constant 0 : index
      %18 = vector.load %arg9[%c0_10, %c0_11] : memref<32x3xf32, #tpu.memory_space<vmem>>, vector<32x3xf32>
      %19 = arith.truncf %18 : vector<32x3xf32> to vector<32x3xbf16>
      %c0_12 = arith.constant 0 : index
      %c0_13 = arith.constant 0 : index
      %20 = vector.load %arg3[%c0_12, %c0_13] : memref<32x32xbf16, #tpu.memory_space<vmem>>, vector<32x32xbf16>
      %cst_14 = arith.constant dense<0.000000e+00> : vector<32x3xf32>
      %21 = tpu.matmul %20, %19, %cst_14 {dimension_numbers = #tpu.dot_dimension_numbers<[1], [0], [0], [1], [0, 0, 1, 1], [], []>} : vector<32x32xbf16>, vector<32x3xbf16>, vector<32x3xf32> -> vector<32x3xf32>
      %c0_15 = arith.constant 0 : index
      %c0_16 = arith.constant 0 : index
      %22 = vector.load %arg4[%c0_15, %c0_16] : memref<32x1xf32, #tpu.memory_space<vmem>>, vector<32x1xf32>
      %23 = vector.broadcast %22 : vector<32x1xf32> to vector<32x3xf32>
      %24 = arith.addf %21, %23 : vector<32x3xf32>
      %cst_17 = arith.constant 2.000000e+01 : f32
      %25 = vector.broadcast %cst_17 : f32 to vector<32x3xf32>
      %26 = arith.minimumf %24, %25 : vector<32x3xf32>
      %27 = math.exp %26 : vector<32x3xf32>
      %cst_18 = arith.constant 1.000000e+00 : f32
      %28 = vector.broadcast %cst_18 : f32 to vector<32x3xf32>
      %29 = arith.addf %28, %27 : vector<32x3xf32>
      %cst_19 = arith.constant 1.000000e+00 : f32
      %30 = vector.broadcast %cst_19 : f32 to vector<32x3xf32>
      %31 = arith.addf %30, %27 : vector<32x3xf32>
      %32 = arith.mulf %29, %31 : vector<32x3xf32>
      %cst_20 = arith.constant 1.000000e+00 : f32
      %33 = vector.broadcast %cst_20 : f32 to vector<32x3xf32>
      %34 = arith.subf %32, %33 : vector<32x3xf32>
      %35 = arith.mulf %24, %34 : vector<32x3xf32>
      %cst_21 = arith.constant 1.000000e+00 : f32
      %36 = vector.broadcast %cst_21 : f32 to vector<32x3xf32>
      %37 = arith.addf %32, %36 : vector<32x3xf32>
      %38 = tpu.reciprocal %37 {approx = true} : vector<32x3xf32> -> vector<32x3xf32>
      %39 = arith.mulf %35, %38 : vector<32x3xf32>
      %c0_22 = arith.constant 0 : index
      %c0_23 = arith.constant 0 : index
      %40 = vector.load %arg5[%c0_22, %c0_23] : memref<32x32xbf16, #tpu.memory_space<vmem>>, vector<32x32xbf16>
      %41 = arith.truncf %39 : vector<32x3xf32> to vector<32x3xbf16>
      %cst_24 = arith.constant dense<0.000000e+00> : vector<32x3xf32>
      %42 = tpu.matmul %40, %41, %cst_24 {dimension_numbers = #tpu.dot_dimension_numbers<[1], [0], [0], [1], [0, 0, 1, 1], [], []>} : vector<32x32xbf16>, vector<32x3xbf16>, vector<32x3xf32> -> vector<32x3xf32>
      %c0_25 = arith.constant 0 : index
      %c0_26 = arith.constant 0 : index
      %43 = vector.load %arg6[%c0_25, %c0_26] : memref<32x1xf32, #tpu.memory_space<vmem>>, vector<32x1xf32>
      %44 = vector.broadcast %43 : vector<32x1xf32> to vector<32x3xf32>
      %45 = arith.addf %42, %44 : vector<32x3xf32>
      %c0_27 = arith.constant 0 : index
      %c0_28 = arith.constant 0 : index
      %46 = vector.load %arg7[%c0_27, %c0_28] : memref<64x32xbf16, #tpu.memory_space<vmem>>, vector<64x32xbf16>
      %47 = arith.truncf %45 : vector<32x3xf32> to vector<32x3xbf16>
      %cst_29 = arith.constant dense<0.000000e+00> : vector<64x3xf32>
      %48 = tpu.matmul %46, %47, %cst_29 {dimension_numbers = #tpu.dot_dimension_numbers<[1], [0], [0], [1], [0, 0, 1, 1], [], []>} : vector<64x32xbf16>, vector<32x3xbf16>, vector<64x3xf32> -> vector<64x3xf32>
      %49 = arith.truncf %48 : vector<64x3xf32> to vector<64x3xbf16>
      %c0_30 = arith.constant 0 : index
      %c0_31 = arith.constant 0 : index
      %50 = vector.load %arg8[%c0_30, %c0_31] : memref<64x3xbf16, #tpu.memory_space<vmem>>, vector<64x3xbf16>
      tpu.vector_store %arg8[%c0_30, %c0_31], %49 {strides = array<i32>} : memref<64x3xbf16, #tpu.memory_space<vmem>>, vector<64x3xbf16>,
    } else {
    }
    return
  }
  func.func @transform_0(%arg0: i32) -> (i32, i32) {
    %c0_i32 = arith.constant 0 : i32
    %c0_i32_0 = arith.constant 0 : i32
    return %c0_i32, %arg0 : i32, i32
  }
  func.func @transform_1(%arg0: i32) -> (i32, i32) {
    %c0_i32 = arith.constant 0 : i32
    %c0_i32_0 = arith.constant 0 : i32
    return %arg0, %c0_i32 : i32, i32
  }
  func.func @transform_2(%arg0: i32) -> (i32, i32) {
    %c0_i32 = arith.constant 0 : i32
    %c0_i32_0 = arith.constant 0 : i32
    %c0_i32_1 = arith.constant 0 : i32
    return %c0_i32, %c0_i32_0 : i32, i32
  }
  func.func @transform_3(%arg0: i32) -> (i32, i32) {
    %c0_i32 = arith.constant 0 : i32
    %c0_i32_0 = arith.constant 0 : i32
    %c0_i32_1 = arith.constant 0 : i32
    return %c0_i32, %c0_i32_0 : i32, i32
  }
  func.func @transform_4(%arg0: i32) -> (i32, i32) {
    %c0_i32 = arith.constant 0 : i32
    %c0_i32_0 = arith.constant 0 : i32
    %c0_i32_1 = arith.constant 0 : i32
    return %c0_i32, %c0_i32_0 : i32, i32
  }
  func.func @transform_5(%arg0: i32) -> (i32, i32) {
    %c0_i32 = arith.constant 0 : i32
    %c0_i32_0 = arith.constant 0 : i32
    %c0_i32_1 = arith.constant 0 : i32
    return %c0_i32, %c0_i32_0 : i32, i32
  }
  func.func @transform_6(%arg0: i32) -> (i32, i32) {
    %c0_i32 = arith.constant 0 : i32
    %c0_i32_0 = arith.constant 0 : i32
    %c0_i32_1 = arith.constant 0 : i32
    return %c0_i32, %c0_i32_0 : i32, i32
  }
  func.func @transform_7(%arg0: i32) -> (i32, i32) {
    %c0_i32 = arith.constant 0 : i32
    %c0_i32_0 = arith.constant 0 : i32
    %c0_i32_1 = arith.constant 0 : i32
    return %c0_i32, %c0_i32_0 : i32, i32
  }
}

</mosaic_0001>

<bundles_post_ra>
// kernel: tpu_custom_call.1
= control target key start
LH: loop header
LB: loop body
LE: loop exit
PB: predicated region body
PF: predicated region fallthrough
CT: control target
= control target key end

     0   :  { %v799_v0 = vmov 0   ;;  %vm31_vm0 = vcmask 23552   ;;  %v800_v26 = vmov 0.0   ;;  %v52_v27 = vlaneseq  ;;  %s992_s1 = inlined_call_operand.vmem [shape: s32[128,1], index: 1, kind: input, shape index: {}]   ;;  %s993_s3 = inlined_call_operand.vmem [shape: f32[32,1], index: 3, kind: input, shape index: {}]   ;;  %s994_s5 = inlined_call_operand.vmem [shape: f32[32,1], index: 5, kind: input, shape index: {}]   ;;  %s995_s0 = inlined_call_operand.vmem [shape: bf16[32,128], index: 0, kind: input, shape index: {}]   ;;  %s996_s2 = inlined_call_operand.vmem [shape: bf16[32,32], index: 2, kind: input, shape index: {}]   ;;  %s997_s4 = inlined_call_operand.vmem [shape: bf16[32,32], index: 4, kind: input, shape index: {}]   ;;  %s998_s6 = inlined_call_operand.vmem [shape: bf16[64,32], index: 6, kind: input, shape index: {}]   ;;  %s999_s7 = inlined_call_operand.vmem [shape: bf16[64,3], index: 7, kind: output, shape index: {}]  }
   0x1   :  { %772 = vset.pattern.permute.xlu1 %v799_v0  ;;  %771 = vset.pattern.permute.xlu0 %v799_v0  ;;  %v38_v1 = vld [vmem:[%s992_s1 + $0x10] sm:$0xff]  ;;  %v36_v2 = vld [vmem:[%s992_s1] sm:$0xff]  ;;  %v39_v3 = vld [vmem:[%s992_s1 + $0x18] sm:$0xff]  ;;  %34 = vst.msk [vmem:[#allocation2 + $0x10] sm:$0xff] %vm31_vm0, %v800_v26  ;;  %v801_v33 = vmov 1.0|1.0  }
   0x2   :  { %61 = vperm.xlu1 %772, %v38_v1   ;;  %55 = vperm.xlu0 %771, %v36_v2   ;;  %v37_v4 = vld [vmem:[%s992_s1 + $0x8] sm:$0xff]  ;;  %v40_v6 = vld [vmem:[%s992_s1 + $0x20] sm:$0xff]  ;;  %v43_v7 = vld [vmem:[%s992_s1 + $0x38] sm:$0xff]  ;;  %32 = vst.msk [vmem:[#allocation2] sm:$0xff] %vm31_vm0, %v800_v26  ;;  %v53_v30 = vand.u32 127, %v52_v27 }
   0x3   :  { %v41_v5 = vld [vmem:[%s992_s1 + $0x28] sm:$0xff]  ;;  %v42_v8 = vld [vmem:[%s992_s1 + $0x30] sm:$0xff]  ;;  %v44_v10 = vld [vmem:[%s992_s1 + $0x40] sm:$0xff]  ;;  %33 = vst.msk [vmem:[#allocation2 + $0x8] sm:$0xff] %vm31_vm0, %v800_v26 }
   0x4   :  { %v45_v9 = vld [vmem:[%s992_s1 + $0x48] sm:$0xff]  ;;  %v47_v11 = vld [vmem:[%s992_s1 + $0x58] sm:$0xff]  ;;  %v46_v12 = vld [vmem:[%s992_s1 + $0x50] sm:$0xff]  ;;  %35 = vst.msk [vmem:[#allocation2 + $0x18] sm:$0xff] %vm31_vm0, %v800_v26 }
   0x5   :  { %v49_v13 = vld [vmem:[%s992_s1 + $0x68] sm:$0xff]  ;;  %v48_v14 = vld [vmem:[%s992_s1 + $0x60] sm:$0xff]  ;;  %v51_v15 = vld [vmem:[%s992_s1 + $0x78] sm:$0xff] }
   0x6   :  { %64 = vperm.xlu1 %772, %v39_v3   ;;  %58 = vperm.xlu0 %771, %v37_v4   ;;  %v50_v16 = vld [vmem:[%s992_s1 + $0x70] sm:$0xff]  ;;  %v250_v17 = vld [vmem:[%s993_s3 + $0x8] sm:$0xff]  ;;  %v249_v18 = vld [vmem:[%s993_s3] sm:$0xff] }
   0x7   :  { %v252_v19 = vld [vmem:[%s993_s3 + $0x18] sm:$0xff]  ;;  %v251_v20 = vld [vmem:[%s993_s3 + $0x10] sm:$0xff]  ;;  %v386_v21 = vld [vmem:[%s994_s5 + $0x8] sm:$0xff] }
   0x8   :  { %v773_v22 = vld [vmem:[%s995_s0] sm:$0xff]   ;;  %v388_v24 = vld [vmem:[%s994_s5 + $0x18] sm:$0xff]  ;;  %v387_v25 = vld [vmem:[%s994_s5 + $0x10] sm:$0xff] }
   0x9   :  { %v385_v23 = vld [vmem:[%s994_s5] sm:$0xff]  ;;  %736 = vmatprep.mubr.bf16.mxu0 %v773_v22  ;;  %v774_v46 = vld [vmem:[%s995_s0 + $0x8] sm:$0xff]   ;;  %v160_v48 = vld [vmem:[#allocation2 + $0x10] sm:$0xff] }
   0xa   :  { %70 = vperm.xlu1 %772, %v41_v5   ;;  %67 = vperm.xlu0 %771, %v40_v6   ;;  %v775_v47 = vld [vmem:[%s996_s2] sm:$0xff]   ;;  %v159_v54 = vld [vmem:[#allocation2 + $0x8] sm:$0xff] }
   0xb   :  { %v158_v49 = vld [vmem:[#allocation2] sm:$0xff]  ;;  %v161_v51 = vld [vmem:[#allocation2 + $0x18] sm:$0xff]  ;;  %v776_v2 = vld [vmem:[%s996_s2 + $0x8] sm:$0xff]  }
   0xc   :  { %v777_v3 = vld [vmem:[%s997_s4] sm:$0xff]  }
   0xe   :  { %76 = vperm.xlu1 %772, %v43_v7   ;;  %73 = vperm.xlu0 %771, %v42_v8  }
  0x12   :  { %82 = vperm.xlu1 %772, %v45_v9   ;;  %79 = vperm.xlu0 %771, %v44_v10  }
  0x16   :  { %88 = vperm.xlu1 %772, %v47_v11   ;;  %85 = vperm.xlu0 %771, %v46_v12  }
  0x1a   :  { %94 = vperm.xlu1 %772, %v49_v13   ;;  %91 = vperm.xlu0 %771, %v48_v14  }
  0x1e   :  { %100 = vperm.xlu1 %772, %v51_v15   ;;  %97 = vperm.xlu0 %771, %v50_v16  }
  0x22   :  { %260 = vperm.xlu1 %772, %v250_v17   ;;  %255 = vperm.xlu0 %771, %v249_v18  }
  0x26   :  { %270 = vperm.xlu1 %772, %v252_v19   ;;  %265 = vperm.xlu0 %771, %v251_v20  }
  0x2a   :  { %396 = vperm.xlu1 %772, %v386_v21   ;;  %391 = vperm.xlu0 %771, %v385_v23  }
  0x2e   :  { %406 = vperm.xlu1 %772, %v388_v24   ;;  %401 = vperm.xlu0 %771, %v387_v25  }
  0x81   :  { %v62_v28 = vpop.permute.xlu1 %61  ;;  %v56_v29 = vpop.permute.xlu0 %55 }
  0x82   :  { %vm104_vm2 = vcmp.eq.s32.totalorder %v62_v28, %v53_v30  ;;  %vm102_vm3 = vcmp.eq.s32.totalorder %v56_v29, %v53_v30 }
  0x85   :  { %v65_v31 = vpop.permute.xlu1 %64  ;;  %v59_v32 = vpop.permute.xlu0 %58 }
  0x86   :  { %vm103_vm1 = vcmp.eq.s32.totalorder %v59_v32, %v53_v30  ;;  %vm105_vm4 = vcmp.eq.s32.totalorder %v65_v31, %v53_v30 }
  0x87   :  { %vm644_vm5 = vmpackc.low %vm103_vm1, %vm102_vm3 }
  0x88   :  { %720 = vmatprep.subr.msk.bf16.mxu0 %vm644_vm5, %v801_v33  ;;  %vm646_vm6 = vmpackc.low %vm105_vm4, %vm104_vm2 }
  0x89   :  { %v71_v34 = vpop.permute.xlu1 %70  ;;  %v68_v35 = vpop.permute.xlu0 %67  ;;  %721 = vmatpush3.bf16.msk.msra.mxu0 %vm644_vm5, %v801_v33 }
  0x8a   :  { %vm107_vm7 = vcmp.eq.s32.totalorder %v71_v34, %v53_v30  ;;  %vm106_vm8 = vcmp.eq.s32.totalorder %v68_v35, %v53_v30  ;;  %722 = vmatprep.subr.msk.bf16.mxu0 %vm646_vm6, %v801_v33 }
  0x8b   :  { %vm648_vm9 = vmpackc.low %vm107_vm7, %vm106_vm8 }
  0x8d   :  { %v77_v36 = vpop.permute.xlu1 %76  ;;  %v74_v37 = vpop.permute.xlu0 %73  ;;  %723 = vmatpush3.bf16.msk.msra.mxu0 %vm646_vm6, %v801_v33 }
  0x8e   :  { %vm109_vm10 = vcmp.eq.s32.totalorder %v77_v36, %v53_v30  ;;  %vm108_vm11 = vcmp.eq.s32.totalorder %v74_v37, %v53_v30  ;;  %724 = vmatprep.subr.msk.bf16.mxu0 %vm648_vm9, %v801_v33 }
  0x8f   :  { %vm650_vm12 = vmpackc.low %vm109_vm10, %vm108_vm11  ;;  %vm283_vm10 = vcmask 261120  }
  0x90   :  { %744 = vmatprep.mubr.msk.bf16.mxu1 %vm283_vm10, %v775_v47 }
  0x91   :  { %v83_v38 = vpop.permute.xlu1 %82  ;;  %v80_v39 = vpop.permute.xlu0 %79  ;;  %725 = vmatpush3.bf16.msk.msra.mxu0 %vm648_vm9, %v801_v33 }
  0x92   :  { %vm111_vm13 = vcmp.eq.s32.totalorder %v83_v38, %v53_v30  ;;  %vm110_vm14 = vcmp.eq.s32.totalorder %v80_v39, %v53_v30  ;;  %726 = vmatprep.subr.msk.bf16.mxu0 %vm650_vm12, %v801_v33 }
  0x93   :  { %vm652_vm15 = vmpackc.low %vm111_vm13, %vm110_vm14 }
  0x95   :  { %v89_v40 = vpop.permute.xlu1 %88  ;;  %v86_v41 = vpop.permute.xlu0 %85  ;;  %727 = vmatpush3.bf16.msk.msra.mxu0 %vm650_vm12, %v801_v33 }
  0x96   :  { %vm113_vm1 = vcmp.eq.s32.totalorder %v89_v40, %v53_v30  ;;  %vm112_vm2 = vcmp.eq.s32.totalorder %v86_v41, %v53_v30  ;;  %728 = vmatprep.subr.msk.bf16.mxu0 %vm652_vm15, %v801_v33 }
  0x97   :  { %vm654_vm3 = vmpackc.low %vm113_vm1, %vm112_vm2 }
  0x99   :  { %v95_v42 = vpop.permute.xlu1 %94  ;;  %v92_v43 = vpop.permute.xlu0 %91  ;;  %729 = vmatpush3.bf16.msk.msra.mxu0 %vm652_vm15, %v801_v33 }
  0x9a   :  { %vm115_vm4 = vcmp.eq.s32.totalorder %v95_v42, %v53_v30  ;;  %vm114_vm5 = vcmp.eq.s32.totalorder %v92_v43, %v53_v30  ;;  %730 = vmatprep.subr.msk.bf16.mxu0 %vm654_vm3, %v801_v33 }
  0x9b   :  { %vm656_vm6 = vmpackc.low %vm115_vm4, %vm114_vm5 }
  0x9d   :  { %v101_v44 = vpop.permute.xlu1 %100  ;;  %v98_v45 = vpop.permute.xlu0 %97  ;;  %731 = vmatpush3.bf16.msk.msra.mxu0 %vm654_vm3, %v801_v33 }
  0x9e   :  { %vm117_vm7 = vcmp.eq.s32.totalorder %v101_v44, %v53_v30  ;;  %vm116_vm8 = vcmp.eq.s32.totalorder %v98_v45, %v53_v30  ;;  %732 = vmatprep.subr.msk.bf16.mxu0 %vm656_vm6, %v801_v33 }
  0x9f   :  { %vm658_vm9 = vmpackc.low %vm117_vm7, %vm116_vm8 }
  0xa1   :  { %733 = vmatpush3.bf16.msk.msra.mxu0 %vm656_vm6, %v801_v33  ;;  %v256_v4 = vpop.permute.xlu0 %255  ;;  %v261_v5 = vpop.permute.xlu1 %260 }
  0xa2   :  { %734 = vmatprep.subr.msk.bf16.mxu0 %vm658_vm9, %v801_v33 }
  0xa5   :  { %735 = vmatpush3.bf16.msk.msra.mxu0 %vm658_vm9, %v801_v33  ;;  %v266_v6 = vpop.permute.xlu0 %265  ;;  %v271_v10 = vpop.permute.xlu1 %270 }
  0xa8   :  { %737 = vmatmul.mubr.bf16.vlgmr.msra.gmra.mrb[0].mxu0 %v774_v46 }
 0x17b   :  { %v738_v50 = vpop.f32.mrb[0].mxu0 }
 0x17c   :  { %v229_v52 = vadd.f32 %v738_v50, %v160_v48  ;;  %v212_v53 = vpop.f32.mrb[1].mxu0 }
 0x17d   :  { %v227_v55 = vadd.f32 %v212_v53, %v158_v49  ;;  %v739_v56 = vpop.f32.mrb[2].mxu0 }
 0x17e   :  { %234 = vst.msk [vmem:[#allocation2 + $0x10] sm:$0xff] %vm31_vm0, %v229_v52  ;;  %v230_v57 = vadd.f32 %v739_v56, %v161_v51  ;;  %v215_v58 = vpop.f32.mrb[3].mxu0 }
 0x17f   :  { %232 = vst.msk [vmem:[#allocation2] sm:$0xff] %vm31_vm0, %v227_v55  ;;  %v228_v59 = vadd.f32 %v215_v58, %v159_v54  ;;  %v778_v58 = vld [vmem:[%s997_s4 + $0x8] sm:$0xff]  }
 0x180   :  { %235 = vst.msk [vmem:[#allocation2 + $0x18] sm:$0xff] %vm31_vm0, %v230_v57 }
 0x181   :  { %233 = vst.msk [vmem:[#allocation2 + $0x8] sm:$0xff] %vm31_vm0, %v228_v59  ;;  %v779_v59 = vld [vmem:[%s998_s6] sm:$0xff]   ;;  %vm613_vm0 = vcmask 19456  }
 0x185   :  { %v241_v0 = vld [vmem:[#allocation2 + $0x10] sm:$0xff] }
 0x186   :  { %v239_v60 = vld [vmem:[#allocation2] sm:$0xff] }
 0x187   :  { %v242_v62 = vld [vmem:[#allocation2 + $0x18] sm:$0xff] }
 0x188   :  { %v240_v61 = vld [vmem:[#allocation2 + $0x8] sm:$0xff]  ;;  %v244_v1 = vpack.c.bf16 %v242_v62, %v241_v0 }
 0x189   :  { %v243_v63 = vpack.c.bf16 %v240_v61, %v239_v60  ;;  %v397_v60 = vpop.permute.xlu1 %396  ;;  %v392_v61 = vpop.permute.xlu0 %391 }
 0x18b   :  { %740 = vmatprep.subr.bf16.mxu1 %v243_v63 }
 0x18c   :  { %741 = vmatpush3.bf16.msra.mxu1 %v243_v63 }
 0x18d   :  { %742 = vmatprep.subr.bf16.mxu1 %v244_v1  ;;  %v407_v63 = vpop.permute.xlu1 %406 }
 0x190   :  { %743 = vmatpush3.bf16.msra.mxu1 %v244_v1  ;;  %v402_v1 = vpop.permute.xlu0 %401 }
 0x193   :  { %745 = vmatmul.mubr.msk.bf16.vlgmr.msra.gmra.mrb[0].mxu1 %vm283_vm10, %v776_v2 }
 0x194   :  { %752 = vmatprep.mubr.msk.bf16.mxu1 %vm283_vm10, %v777_v3 }
 0x266   :  { %v746_v7 = vpop.f32.mrb[0].mxu1 }
 0x267   :  { %v333_v8 = vadd.f32 %v746_v7, %v266_v6  ;;  %v324_v9 = vpop.f32.mrb[1].mxu1 }
 0x268   :  { %v325_v11 = vadd.f32 %v324_v9, %v256_v4  ;;  %v747_v12 = vpop.f32.mrb[2].mxu1 }
 0x269   :  { %v341_v13 = vmin.f32 %v333_v8, 20.0  ;;  %v336_v14 = vadd.f32 %v747_v12, %v271_v10  ;;  %v327_v15 = vpop.f32.mrb[3].mxu1  ;;  %v780_v10 = vld [vmem:[%s998_s6 + $0x8] sm:$0xff]   ;;  %v782_v12 = vld [vmem:[%s998_s6 + $0x18] sm:$0xff]  }
 0x26a   :  { %v339_v16 = vmin.f32 %v325_v11, 20.0  ;;  %v328_v17 = vadd.f32 %v327_v15, %v261_v5 }
 0x26b   :  { %v347_v18 = vmul.f32 1.442695, %v341_v13  ;;  %v342_v19 = vmin.f32 %v336_v14, 20.0 }
 0x26c   :  { %v343_v20 = vmul.f32 1.442695, %v339_v16  ;;  %v340_v21 = vmin.f32 %v328_v17, 20.0 }
 0x26d   :  { %783 = vpow2.f32 %v347_v18  ;;  %v349_v22 = vmul.f32 1.442695, %v342_v19 }
 0x26e   :  { %785 = vpow2.f32 %v343_v20  ;;  %v345_v23 = vmul.f32 1.442695, %v340_v21 }
 0x26f   :  { %787 = vpow2.f32 %v349_v22 }
 0x270   :  { %789 = vpow2.f32 %v345_v23 }
 0x277   :  { %v784_v24 = vpop.eup %783 }
 0x278   :  { %v786_v25 = vpop.eup %785  ;;  %v353_v26 = vadd.f32 1.0, %v784_v24 }
 0x279   :  { %v788_v27 = vpop.eup %787  ;;  %v351_v28 = vadd.f32 1.0, %v786_v25 }
 0x27a   :  { %v790_v29 = vpop.eup %789  ;;  %v357_v30 = vmul.f32 %v353_v26, %v353_v26  ;;  %v354_v31 = vadd.f32 1.0, %v788_v27 }
 0x27b   :  { %v355_v32 = vmul.f32 %v351_v28, %v351_v28  ;;  %v352_v33 = vadd.f32 1.0, %v790_v29 }
 0x27c   :  { %v369_v34 = vadd.f32 1.0, %v357_v30  ;;  %v358_v35 = vmul.f32 %v354_v31, %v354_v31  ;;  %v666_v40 = vadd.f32 -1.0, %v357_v30 }
 0x27d   :  { %v367_v36 = vadd.f32 1.0, %v355_v32  ;;  %v356_v37 = vmul.f32 %v352_v33, %v352_v33  ;;  %v664_v42 = vadd.f32 -1.0, %v355_v32 }
 0x27e   :  { %791 = vrcp.f32 %v369_v34  ;;  %v370_v38 = vadd.f32 1.0, %v358_v35  ;;  %v667_v41 = vadd.f32 -1.0, %v358_v35  ;;  %v365_v46 = vmul.f32 %v666_v40, %v333_v8 }
 0x27f   :  { %793 = vrcp.f32 %v367_v36  ;;  %v368_v39 = vadd.f32 1.0, %v356_v37  ;;  %v665_v43 = vadd.f32 -1.0, %v356_v37  ;;  %v363_v49 = vmul.f32 %v664_v42, %v325_v11  ;;  %v781_v11 = vld [vmem:[%s998_s6 + $0x10] sm:$0xff]  }
 0x280   :  { %795 = vrcp.f32 %v370_v38  ;;  %v366_v47 = vmul.f32 %v667_v41, %v336_v14 }
 0x281   :  { %797 = vrcp.f32 %v368_v39  ;;  %v364_v50 = vmul.f32 %v665_v43, %v328_v17 }
 0x288   :  { %v792_v44 = vpop.eup %791 }
 0x289   :  { %v794_v45 = vpop.eup %793  ;;  %v377_v52 = vmul.f32 %v792_v44, %v365_v46 }
 0x28a   :  { %v796_v48 = vpop.eup %795  ;;  %v375_v54 = vmul.f32 %v794_v45, %v363_v49 }
 0x28b   :  { %v798_v51 = vpop.eup %797  ;;  %v378_v53 = vmul.f32 %v796_v48, %v366_v47 }
 0x28c   :  { %v376_v55 = vmul.f32 %v798_v51, %v364_v50 }
 0x28d   :  { %v384_v56 = vpack.c.bf16 %v378_v53, %v377_v52 }
 0x28e   :  { %v383_v57 = vpack.c.bf16 %v376_v55, %v375_v54 }
 0x290   :  { %748 = vmatprep.subr.bf16.mxu1 %v383_v57 }
 0x291   :  { %749 = vmatpush3.bf16.msra.mxu1 %v383_v57 }
 0x292   :  { %750 = vmatprep.subr.bf16.mxu1 %v384_v56 }
 0x295   :  { %751 = vmatpush3.bf16.msra.mxu1 %v384_v56 }
 0x298   :  { %753 = vmatmul.mubr.msk.bf16.vlgmr.msra.gmra.mrb[4].mxu1 %vm283_vm10, %v778_v58 }
 0x299   :  { %760 = vmatprep.mubr.msk.bf16.mxu1 %vm283_vm10, %v779_v59 }
 0x36b   :  { %v754_v62 = vpop.f32.mrb[4].mxu1 }
 0x36c   :  { %v459_v0 = vpop.f32.mrb[5].mxu1  ;;  %v468_v3 = vadd.f32 %v754_v62, %v402_v1 }
 0x36d   :  { %v755_v2 = vpop.f32.mrb[6].mxu1  ;;  %v460_v6 = vadd.f32 %v459_v0, %v392_v61 }
 0x36e   :  { %v471_v4 = vadd.f32 %v755_v2, %v407_v63  ;;  %v462_v5 = vpop.f32.mrb[7].mxu1 }
 0x36f   :  { %v463_v7 = vadd.f32 %v462_v5, %v397_v60 }
 0x370   :  { %v483_v8 = vpack.c.bf16 %v471_v4, %v468_v3 }
 0x371   :  { %v482_v9 = vpack.c.bf16 %v463_v7, %v460_v6 }
 0x373   :  { %756 = vmatprep.subr.bf16.mxu1 %v482_v9 }
 0x374   :  { %757 = vmatpush3.bf16.msra.mxu1 %v482_v9 }
 0x375   :  { %758 = vmatprep.subr.bf16.mxu1 %v483_v8 }
 0x378   :  { %759 = vmatpush3.bf16.msra.mxu1 %v483_v8 }
 0x37b   :  { %761 = vmatmul.mubr.msk.bf16.vlgmr.msra.gmra.mrb[8].mxu1 %vm283_vm10, %v780_v10 }
 0x37c   :  { %764 = vmatprep.mubr.msk.bf16.mxu1 %vm283_vm10, %v781_v11 }
 0x383   :  { %765 = vmatmul.mubr.msk.bf16.gmra.mrb[12].mxu1 %vm283_vm10, %v782_v12 }
 0x44e   :  { %v762_v13 = vpop.f32.mrb[8].mxu1 }
 0x44f   :  { %v690_v14 = vpack.c.bf16 %v762_v13, %v762_v13  ;;  %v550_v15 = vpop.f32.mrb[9].mxu1 }
 0x450   :  { %v688_v16 = vpack.c.bf16 %v550_v15, %v550_v15  ;;  %v763_v17 = vpop.f32.mrb[10].mxu1 }
 0x451   :  { %616 = vst.msk [vmem:[%s999_s7 + $0x8] sm:$0xf] %vm613_vm0, %v690_v14  ;;  %v691_v18 = vpack.c.bf16 %v763_v17, %v763_v17  ;;  %v553_v19 = vpop.f32.mrb[11].mxu1 }
 0x452   :  { %614 = vst.msk [vmem:[%s999_s7] sm:$0xf] %vm613_vm0, %v688_v16  ;;  %v689_v20 = vpack.c.bf16 %v553_v19, %v553_v19 }
 0x453   :  { %617 = vst.msk [vmem:[%s999_s7 + $0xc] sm:$0xf] %vm613_vm0, %v691_v18 }
 0x454   :  { %615 = vst.msk [vmem:[%s999_s7 + $0x4] sm:$0xf] %vm613_vm0, %v689_v20 }
 0x456   :  { %v766_v21 = vpop.f32.mrb[12].mxu1 }
 0x457   :  { %v694_v22 = vpack.c.bf16 %v766_v21, %v766_v21  ;;  %v566_v23 = vpop.f32.mrb[13].mxu1 }
 0x458   :  { %v692_v24 = vpack.c.bf16 %v566_v23, %v566_v23  ;;  %v767_v25 = vpop.f32.mrb[14].mxu1 }
 0x459   :  { %620 = vst.msk [vmem:[%s999_s7 + $0x18] sm:$0xf] %vm613_vm0, %v694_v22  ;;  %v695_v26 = vpack.c.bf16 %v767_v25, %v767_v25  ;;  %v569_v27 = vpop.f32.mrb[15].mxu1 }
 0x45a   :  { %618 = vst.msk [vmem:[%s999_s7 + $0x10] sm:$0xf] %vm613_vm0, %v692_v24  ;;  %v693_v28 = vpack.c.bf16 %v569_v27, %v569_v27 }
 0x45b   :  { %621 = vst.msk [vmem:[%s999_s7 + $0x1c] sm:$0xf] %vm613_vm0, %v695_v26 }
 0x45c   :  { %619 = vst.msk [vmem:[%s999_s7 + $0x14] sm:$0xf] %vm613_vm0, %v693_v28 }

</bundles_post_ra>
